<compile_context>
chip_gen: v5e
topology: v5e:2x2
jax: 0.10.0
libtpu: 0.0.40
codegen_flags: <defaults>
</compile_context>

<pallas_src>
import functools
import math

import jax
import jax.numpy as jnp
import numpy as np
from jax import lax
from jax.experimental import pallas as pl
from jax.experimental.pallas import tpu as pltpu


# ----------------------------------------------------------------------------
# Fused per-batch-tile kernel
# ----------------------------------------------------------------------------
def _fused_kernel(head_ref, rel_ref, tail_ref, we_ref, wr_ref, out_ref, *,
                  pad_cols):
    # bf16 DMA operands (halved traffic); weights arrive pre-cast to bf16.
    head_bf = head_ref[...]           # [Bb, Dt]    bf16
    rel_bf = rel_ref[...]             # [Bb, Dt]    bf16
    tail_bf = tail_ref[...]           # [Bb, N, Dt] bf16 (positive at n=0)
    we_bf = we_ref[...]               # [Dt, Ds]    bf16 (VMEM-resident)
    wr_bf = wr_ref[...]               # [Dt, Ds]    bf16 (VMEM-resident)

    bb = head_bf.shape[0]

    # Single per-tile upcast; all elementwise work stays f32 (v5e-safe).
    head = head_bf.astype(jnp.float32)
    rel = rel_bf.astype(jnp.float32)
    tail = tail_bf.astype(jnp.float32)

    # ---- teacher score: DistMult on teacher embeddings (f32 VPU/XLU reduce) --
    hr_t = head * rel                                                  # [Bb, Dt]
    t_score = jnp.sum(tail * hr_t[:, None, :], axis=-1)                # [Bb, N]

    # ---- fused pruner projection: [head ; positive tail] @ We in one MXU call
    lhs = jnp.concatenate([head_bf, tail_bf[:, 0, :]], axis=0)         # [2Bb, Dt]
    proj = lax.dot_general(lhs, we_bf, (((1,), (0,)), ((), ())),
                           preferred_element_type=jnp.float32)         # [2Bb, Ds]
    head_s = proj[:bb]                                                 # [Bb, Ds]
    z = proj[bb:]                                                      # [Bb, Ds]

    rel_s = lax.dot_general(rel_bf, wr_bf, (((1,), (0,)), ((), ())),
                            preferred_element_type=jnp.float32)        # [Bb, Ds]
    hr_s = head_s * rel_s                                              # [Bb, Ds]

    # ---- student score via algebraic rewrite: v = (h_s*r_s) @ We.T ----------
    v = lax.dot_general(hr_s.astype(jnp.bfloat16), we_bf,
                        (((1,), (1,)), ((), ())),
                        preferred_element_type=jnp.float32)            # [Bb, Dt]
    s_score = jnp.sum(tail * v[:, None, :], axis=-1)                   # [Bb, N]

    # ---- contrastive head: L2-normalize projected positive tails ------------
    inv_norm = lax.rsqrt(jnp.sum(z * z, axis=-1, keepdims=True) + 1e-12)
    z_norm = z * inv_norm                                              # [Bb, Ds]

    # ---- lane-dense packed output: one full-width store, unmasked writeback -
    parts = [t_score, s_score, z_norm]
    if pad_cols:
        parts.append(jnp.zeros((bb, pad_cols), jnp.float32))
    out_ref[...] = jnp.concatenate(parts, axis=-1)                     # [Bb, P]


# ----------------------------------------------------------------------------
# VMEM-budget helpers
# ----------------------------------------------------------------------------
def _tpu_vmem_bytes():
    try:
        return int(pltpu.get_tpu_info().vmem_capacity_bytes)
    except Exception:
        return 64 << 20            # conservative fallback (v7x per-TC VMEM)


def _vmem_limit_bytes():
    phys = _tpu_vmem_bytes()
    # ~48 MiB on v7x (64 MiB physical), ~100 MiB on v5e/v6e (128 MiB physical)
    return int(max(32 << 20, min(phys - (16 << 20), 100 << 20)))


def _pick_block_batch(batch, n_tail, d_teacher, p_out):
    """VMEM-budget-aware batch tile; multiple of 16 (bf16 sublane packing)."""
    if batch <= 16:
        return batch
    budget = _tpu_vmem_bytes() // 2    # headroom for weights / compiler scratch
    per_row = (
        2 * 2 * (n_tail * d_teacher + 2 * d_teacher)   # double-buffered bf16 in
        + 4 * n_tail * d_teacher                        # in-kernel f32 tail
        + 2 * 4 * p_out                                 # double-buffered f32 out
    )
    max_rows = max(budget // max(per_row, 1), 16)
    candidates = [d for d in range(16, batch, 16) if batch % d == 0] + [batch]
    fitting = [c for c in candidates if c <= max_rows]
    return max(fitting) if fitting else min(candidates)


# ----------------------------------------------------------------------------
# Pallas call wrapper
# ----------------------------------------------------------------------------
def ckd_scores(head_t, rel_t, tail_t, w_ent, w_rel, *, block_batch=None):
    """Fused kernel: teacher score, student score, normalized pruned pos tails."""
    B, N, Dt = tail_t.shape
    Ds = w_ent.shape[1]

    packed = 2 * N + Ds
    P = max(128, ((packed + 127) // 128) * 128)   # lane-dense output slab width
    pad_cols = P - packed

    # bf16 DMA operands (the gather + cast fuse in XLA, so the materialized
    # tail tensor is already bf16). Weights pre-cast once here, not per step.
    head_bf = head_t.astype(jnp.bfloat16)
    rel_bf = rel_t.astype(jnp.bfloat16)
    tail_bf = tail_t.astype(jnp.bfloat16)
    we_bf = w_ent.astype(jnp.bfloat16)
    wr_bf = w_rel.astype(jnp.bfloat16)

    if block_batch is None:
        block_batch = _pick_block_batch(B, N, Dt, P)
    assert B % block_batch == 0, "batch must be divisible by the batch tile"
    assert block_batch == B or block_batch % 16 == 0, \
        "bf16 batch tile must be 16-aligned"
    grid = (B // block_batch,)

    kernel = functools.partial(_fused_kernel, pad_cols=pad_cols)

    out = pl.pallas_call(
        kernel,
        out_shape=jax.ShapeDtypeStruct((B, P), jnp.float32),
        grid=grid,
        in_specs=[
            pl.BlockSpec((block_batch, Dt), lambda i: (i, 0)),
            pl.BlockSpec((block_batch, Dt), lambda i: (i, 0)),
            pl.BlockSpec((block_batch, N, Dt), lambda i: (i, 0, 0)),
            pl.BlockSpec((Dt, Ds), lambda i: (0, 0)),   # weights stay resident
            pl.BlockSpec((Dt, Ds), lambda i: (0, 0)),
        ],
        out_specs=pl.BlockSpec((block_batch, P), lambda i: (i, 0)),
        compiler_params=pltpu.CompilerParams(
            dimension_semantics=("parallel",),          # independent batch tiles
            vmem_limit_bytes=_vmem_limit_bytes(),
        ),
    )(head_bf, rel_bf, tail_bf, we_bf, wr_bf)

    t_score = out[:, :N]
    s_score = out[:, N:2 * N]
    z = out[:, 2 * N:2 * N + Ds]
    return t_score, s_score, z


# ----------------------------------------------------------------------------
# Forward pass (mode == 'tail-batch'); cheap scalar reductions stay in XLA
# ----------------------------------------------------------------------------
def contrastive_kd_forward(head_t, rel_t, tail_t, w_ent, w_rel,
                           subsampling_weight, *,
                           adversarial_temperature=1.0,
                           kdloss_weight=0.1,
                           ckdloss_weight=0.1,
                           temperature=0.1,
                           block_batch=None):
    t_score, s_score, z = ckd_scores(
        head_t, rel_t, tail_t, w_ent, w_rel, block_batch=block_batch)

    w = subsampling_weight
    w_sum = jnp.sum(w)

    # positive / negative split (column 0 is the positive sample)
    p_score = s_score[:, 0]
    n_score = s_score[:, 1:]

    # self-adversarial negative sampling loss
    pos_ls = jax.nn.log_sigmoid(p_score)
    adv = lax.stop_gradient(
        jax.nn.softmax(n_score * adversarial_temperature, axis=1))
    neg_ls = jnp.sum(adv * jax.nn.log_sigmoid(-n_score), axis=1)
    positive_sample_loss = -jnp.sum(w * pos_ls) / w_sum
    negative_sample_loss = -jnp.sum(w * neg_ls) / w_sum
    base_loss = 0.5 * (positive_sample_loss + negative_sample_loss)

    # knowledge-distillation loss (teacher scores are detached)
    kd_per_sample = jnp.mean(
        (lax.stop_gradient(t_score) - s_score) ** 2, axis=1)
    kd_loss = jnp.sum(w * kd_per_sample) / w_sum

    # contrastive (InfoNCE) loss on pruned positive entities; the only
    # cross-batch coupling (z @ z.T) lives here in plain XLA.  z is L2-normalized.
    # TODO(synk): positive pair is the self-similarity diagonal of z@z.T (as in
    #             in-batch InfoNCE); the injected ContrastiveLoss may instead
    #             compare student vs teacher projections of the same entity.
    sim = lax.dot_general(z, z, (((1,), (1,)), ((), ()))) * (1.0 / temperature)
    log_p = jax.nn.log_softmax(sim, axis=1)
    ce_per_sample = -jnp.diagonal(log_p)
    c_loss = jnp.sum(w * ce_per_sample) / w_sum

    total = base_loss + kdloss_weight * kd_loss + ckdloss_weight * c_loss

    record = {
        "positive_sample_loss": positive_sample_loss,
        "negative_sample_loss": negative_sample_loss,
        "kd_loss": kd_loss,
        "contrastive_loss": c_loss,
        "total_loss": total,
    }
    return total, record, (t_score, s_score, z)


# ----------------------------------------------------------------------------
# Pure-JAX reference (same bf16 quantization / MXU casting as the kernel)
# ----------------------------------------------------------------------------
def _reference_scores(head_t, rel_t, tail_t, w_ent, w_rel):
    bf = jnp.bfloat16
    head = head_t.astype(bf).astype(jnp.float32)
    rel = rel_t.astype(bf).astype(jnp.float32)
    tail = tail_t.astype(bf).astype(jnp.float32)
    we_bf = w_ent.astype(bf)
    wr_bf = w_rel.astype(bf)

    hr_t = head * rel
    t_score = jnp.sum(tail * hr_t[:, None, :], axis=-1)

    head_s = jnp.dot(head_t.astype(bf), we_bf, preferred_element_type=jnp.float32)
    rel_s = jnp.dot(rel_t.astype(bf), wr_bf, preferred_element_type=jnp.float32)
    hr_s = head_s * rel_s
    v = jnp.dot(hr_s.astype(bf), we_bf.T, preferred_element_type=jnp.float32)
    s_score = jnp.sum(tail * v[:, None, :], axis=-1)

    z = jnp.dot(tail_t[:, 0, :].astype(bf), we_bf,
                preferred_element_type=jnp.float32)
    z = z * lax.rsqrt(jnp.sum(z * z, axis=-1, keepdims=True) + 1e-12)
    return t_score, s_score, z


if __name__ == "__main__":
    # ----- deterministic synthetic setup (mode = 'tail-batch') -----
    key = jax.random.PRNGKey(0)
    k1, k2, k3, k4, k5, k6, k7, k8, k9 = jax.random.split(key, 9)

    nentity, nrelation = 64, 16
    B, neg = 32, 7                  # batch, negatives -> N = 1 + neg = 8
    N = 1 + neg
    Dt, Ds = 128, 64                # teacher dim (128-lane dense), student dim
    block_batch = 16                # grid=(2,): exercises pipelined batch tiling

    entity_emb = 0.1 * jax.random.normal(k1, (nentity, Dt), dtype=jnp.float32)
    relation_emb = 0.1 * jax.random.normal(k2, (nrelation, Dt), dtype=jnp.float32)
    w_ent = jax.random.normal(k3, (Dt, Ds), dtype=jnp.float32) / math.sqrt(Dt)
    w_rel = jax.random.normal(k4, (Dt, Ds), dtype=jnp.float32) / math.sqrt(Dt)

    head_ids = jax.random.randint(k5, (B,), 0, nentity)
    rel_ids = jax.random.randint(k6, (B,), 0, nrelation)
    pos_tail_ids = jax.random.randint(k7, (B, 1), 0, nentity)
    neg_tail_ids = jax.random.randint(k8, (B, neg), 0, nentity)
    tail_ids = jnp.concatenate([pos_tail_ids, neg_tail_ids], axis=1)   # [B, N]

    # EmbeddingManager glue: gather embeddings (origin_relation == relation here)
    head_t = entity_emb[head_ids]        # [B, Dt]
    rel_t = relation_emb[rel_ids]        # [B, Dt]
    tail_t = entity_emb[tail_ids]        # [B, N, Dt]
    subsampling_weight = 0.5 + jax.random.uniform(k9, (B,), dtype=jnp.float32)

    total_loss, record, (t_score, s_score, z) = contrastive_kd_forward(
        head_t, rel_t, tail_t, w_ent, w_rel, subsampling_weight,
        adversarial_temperature=1.0,
        kdloss_weight=0.1,
        ckdloss_weight=0.1,
        temperature=0.1,
        block_batch=block_batch,
    )
    jax.block_until_ready(total_loss)

    # correctness check against a pure-JAX reference using identical casting
    t_ref, s_ref, z_ref = _reference_scores(head_t, rel_t, tail_t, w_ent, w_rel)
    np.testing.assert_allclose(np.asarray(t_score), np.asarray(t_ref),
                               rtol=1e-4, atol=1e-5)
    np.testing.assert_allclose(np.asarray(s_score), np.asarray(s_ref),
                               rtol=5e-2, atol=5e-4)
    np.testing.assert_allclose(np.asarray(z), np.asarray(z_ref),
                               rtol=5e-2, atol=2e-3)

    loss_record = {k: float(v) for k, v in record.items()}
    assert all(math.isfinite(v) for v in loss_record.values())
    print("KERNEL_OK")
</pallas_src>

<mosaic_0001>
module attributes {stable_mosaic.version = 11 : i64} {
  func.func @_fused_kernel(%arg0: i32, %arg1: memref<16x128xbf16, #tpu.memory_space<vmem>>, %arg2: memref<16x128xbf16, #tpu.memory_space<vmem>>, %arg3: memref<16x8x128xbf16, #tpu.memory_space<vmem>>, %arg4: memref<128x64xbf16, #tpu.memory_space<vmem>>, %arg5: memref<128x64xbf16, #tpu.memory_space<vmem>>, %arg6: memref<16x128xf32, #tpu.memory_space<vmem>>) attributes {dimension_semantics = [#tpu.dimension_semantics<parallel>], iteration_bounds = array<i64: 2>, scalar_prefetch = 0 : i64, scratch_operands = 0 : i64, tpu.core_type = #tpu.core_type<tc>, window_params = [{transform_indices = @transform_0, window_bounds = array<i64: 16, 128>}, {transform_indices = @transform_1, window_bounds = array<i64: 16, 128>}, {transform_indices = @transform_2, window_bounds = array<i64: 16, 8, 128>}, {pipeline_mode = #tpu.pipeline_mode<synchronous>, transform_indices = @transform_3, window_bounds = array<i64: 128, 64>}, {pipeline_mode = #tpu.pipeline_mode<synchronous>, transform_indices = @transform_4, window_bounds = array<i64: 128, 64>}, {transform_indices = @transform_5, window_bounds = array<i64: 16, 128>}]} {
    %c0 = arith.constant 0 : index
    %c0_0 = arith.constant 0 : index
    %0 = vector.load %arg1[%c0, %c0_0] : memref<16x128xbf16, #tpu.memory_space<vmem>>, vector<16x128xbf16>
    %c0_1 = arith.constant 0 : index
    %c0_2 = arith.constant 0 : index
    %1 = vector.load %arg2[%c0_1, %c0_2] : memref<16x128xbf16, #tpu.memory_space<vmem>>, vector<16x128xbf16>
    %c0_3 = arith.constant 0 : index
    %c0_4 = arith.constant 0 : index
    %c0_5 = arith.constant 0 : index
    %2 = vector.load %arg3[%c0_3, %c0_4, %c0_5] : memref<16x8x128xbf16, #tpu.memory_space<vmem>>, vector<16x8x128xbf16>
    %c0_6 = arith.constant 0 : index
    %c0_7 = arith.constant 0 : index
    %3 = vector.load %arg4[%c0_6, %c0_7] : memref<128x64xbf16, #tpu.memory_space<vmem>>, vector<128x64xbf16>
    %c0_8 = arith.constant 0 : index
    %c0_9 = arith.constant 0 : index
    %4 = vector.load %arg5[%c0_8, %c0_9] : memref<128x64xbf16, #tpu.memory_space<vmem>>, vector<128x64xbf16>
    %5 = arith.extf %0 : vector<16x128xbf16> to vector<16x128xf32>
    %6 = arith.extf %1 : vector<16x128xbf16> to vector<16x128xf32>
    %7 = arith.extf %2 : vector<16x8x128xbf16> to vector<16x8x128xf32>
    %8 = arith.mulf %5, %6 : vector<16x128xf32>
    %9 = vector.shape_cast %8 : vector<16x128xf32> to vector<16x1x128xf32>
    %10 = vector.broadcast %9 : vector<16x1x128xf32> to vector<16x8x128xf32>
    %11 = arith.mulf %7, %10 : vector<16x8x128xf32>
    %cst = arith.constant dense<0.000000e+00> : vector<16x8xf32>
    %12 = vector.multi_reduction <add>, %11, %cst [2] : vector<16x8x128xf32> to vector<16x8xf32>
    %13 = vector.extract_strided_slice %2 {offsets = [0, 0, 0], sizes = [16, 1, 128], strides = [1, 1, 1]} : vector<16x8x128xbf16> to vector<16x1x128xbf16>
    %14 = vector.shape_cast %13 : vector<16x1x128xbf16> to vector<16x128xbf16>
    %15 = tpu.concatenate %0, %14 in 0 : vector<16x128xbf16>, vector<16x128xbf16> -> vector<32x128xbf16>
    %cst_10 = arith.constant dense<0.000000e+00> : vector<32x64xf32>
    %16 = tpu.matmul %15, %3, %cst_10 {dimension_numbers = #tpu.dot_dimension_numbers<[1], [0], [0], [1], [0, 0, 1, 1], [], []>} : vector<32x128xbf16>, vector<128x64xbf16>, vector<32x64xf32> -> vector<32x64xf32>
    %17 = vector.extract_strided_slice %16 {offsets = [0, 0], sizes = [16, 64], strides = [1, 1]} : vector<32x64xf32> to vector<16x64xf32>
    %18 = vector.extract_strided_slice %16 {offsets = [16, 0], sizes = [16, 64], strides = [1, 1]} : vector<32x64xf32> to vector<16x64xf32>
    %cst_11 = arith.constant dense<0.000000e+00> : vector<16x64xf32>
    %19 = tpu.matmul %1, %4, %cst_11 {dimension_numbers = #tpu.dot_dimension_numbers<[1], [0], [0], [1], [0, 0, 1, 1], [], []>} : vector<16x128xbf16>, vector<128x64xbf16>, vector<16x64xf32> -> vector<16x64xf32>
    %20 = arith.mulf %17, %19 : vector<16x64xf32>
    %21 = arith.truncf %20 : vector<16x64xf32> to vector<16x64xbf16>
    %cst_12 = arith.constant dense<0.000000e+00> : vector<16x128xf32>
    %22 = tpu.matmul %21, %3, %cst_12 {dimension_numbers = #tpu.dot_dimension_numbers<[1], [1], [0], [0], [0, 0, 1, 0], [], []>} : vector<16x64xbf16>, vector<128x64xbf16>, vector<16x128xf32> -> vector<16x128xf32>
    %23 = vector.shape_cast %22 : vector<16x128xf32> to vector<16x1x128xf32>
    %24 = vector.broadcast %23 : vector<16x1x128xf32> to vector<16x8x128xf32>
    %25 = arith.mulf %7, %24 : vector<16x8x128xf32>
    %cst_13 = arith.constant dense<0.000000e+00> : vector<16x8xf32>
    %26 = vector.multi_reduction <add>, %25, %cst_13 [2] : vector<16x8x128xf32> to vector<16x8xf32>
    %27 = arith.mulf %18, %18 : vector<16x64xf32>
    %cst_14 = arith.constant dense<0.000000e+00> : vector<16xf32>
    %28 = vector.multi_reduction <add>, %27, %cst_14 [1] : vector<16x64xf32> to vector<16xf32>
    %29 = vector.shape_cast %28 : vector<16xf32> to vector<16x1xf32>
    %cst_15 = arith.constant 9.99999996E-13 : f32
    %30 = vector.broadcast %cst_15 : f32 to vector<16x1xf32>
    %31 = arith.addf %29, %30 : vector<16x1xf32>
    %32 = math.rsqrt %31 : vector<16x1xf32>
    %33 = vector.broadcast %32 : vector<16x1xf32> to vector<16x64xf32>
    %34 = arith.mulf %18, %33 : vector<16x64xf32>
    %cst_16 = arith.constant 0.000000e+00 : f32
    %35 = vector.broadcast %cst_16 : f32 to vector<16x48xf32>
    %36 = tpu.concatenate %12, %26, %34, %35 in 1 : vector<16x8xf32>, vector<16x8xf32>, vector<16x64xf32>, vector<16x48xf32> -> vector<16x128xf32>
    %c0_17 = arith.constant 0 : index
    %c0_18 = arith.constant 0 : index
    %37 = vector.load %arg6[%c0_17, %c0_18] : memref<16x128xf32, #tpu.memory_space<vmem>>, vector<16x128xf32>
    tpu.vector_store %arg6[%c0_17, %c0_18], %36 {strides = array<i32>} : memref<16x128xf32, #tpu.memory_space<vmem>>, vector<16x128xf32>,
    return
  }
  func.func @transform_0(%arg0: i32) -> (i32, i32) {
    %c0_i32 = arith.constant 0 : i32
    %c0_i32_0 = arith.constant 0 : i32
    return %arg0, %c0_i32 : i32, i32
  }
  func.func @transform_1(%arg0: i32) -> (i32, i32) {
    %c0_i32 = arith.constant 0 : i32
    %c0_i32_0 = arith.constant 0 : i32
    return %arg0, %c0_i32 : i32, i32
  }
  func.func @transform_2(%arg0: i32) -> (i32, i32, i32) {
    %c0_i32 = arith.constant 0 : i32
    %c0_i32_0 = arith.constant 0 : i32
    %c0_i32_1 = arith.constant 0 : i32
    return %arg0, %c0_i32, %c0_i32_0 : i32, i32, i32
  }
  func.func @transform_3(%arg0: i32) -> (i32, i32) {
    %c0_i32 = arith.constant 0 : i32
    %c0_i32_0 = arith.constant 0 : i32
    %c0_i32_1 = arith.constant 0 : i32
    return %c0_i32, %c0_i32_0 : i32, i32
  }
  func.func @transform_4(%arg0: i32) -> (i32, i32) {
    %c0_i32 = arith.constant 0 : i32
    %c0_i32_0 = arith.constant 0 : i32
    %c0_i32_1 = arith.constant 0 : i32
    return %c0_i32, %c0_i32_0 : i32, i32
  }
  func.func @transform_5(%arg0: i32) -> (i32, i32) {
    %c0_i32 = arith.constant 0 : i32
    %c0_i32_0 = arith.constant 0 : i32
    return %arg0, %c0_i32 : i32, i32
  }
}

</mosaic_0001>

<bundles_post_ra>
// kernel: tpu_custom_call.1
= control target key start
LH: loop header
LB: loop body
LE: loop exit
PB: predicated region body
PF: predicated region fallthrough
CT: control target
= control target key end

     0   :  { %10 = vsyncpa [#allocation3], 0  ;;  %s1801_s0 = inlined_call_operand.vmem [shape: bf16[32,128], index: 0, kind: input, shape index: {}]   ;;  %s1802_s1 = inlined_call_operand.vmem [shape: bf16[32,128], index: 1, kind: input, shape index: {}]   ;;  %s1803_s2 = inlined_call_operand.vmem [shape: bf16[32,8,128], index: 2, kind: input, shape index: {}]   ;;  %s1804_s3 = inlined_call_operand.vmem [shape: bf16[128,64], index: 3, kind: input, shape index: {}]   ;;  %s1805_s4 = inlined_call_operand.vmem [shape: bf16[128,64], index: 4, kind: input, shape index: {}]   ;;  %s1806_s5 = inlined_call_operand.hbm [shape: f32[32,128], index: 5, kind: output, shape index: {}]  }
   0x1   :  { %12 = vsyncpa [#allocation3 + $0x1], 0  ;;  %s1342_s18 = smov 0   ;;  %s1344_s19 = smov 0  }
   0x2   :  { %s1346_s20 = smov 0   ;;  %s1348_s21 = smov 0  }
   0x3 LB: > { %s1363_s22 = sadd.s32 4294967295, %s1307_s21   ;;  %s1075_s23 = sadd.s32 4294967294, %s1307_s21   ;;  %s1307_s21 = sphi %s1348_s21, %s1812_s21   ;;  %s1303_s20 = sphi %s1346_s20, %s1811_s20   ;;  %s1299_s19 = sphi %s1344_s19, %s1810_s19   ;;  %s1295_s18 = sphi %s1342_s18, %s1809_s18  }
   0x4   : > { %s1367_s24 = sadd.s32 1, %s1307_s21   ;;  %s145_s25 = sadd.s32 1, %s1303_s20 }
   0x5   : > { %s142_s26 = ssub.s32 %s1307_s21, %s1367_s24  ;;  %p155_p0 = scmp.ne.s32.totalorder %s1303_s20, %s1299_s19 }
   0x6   : > { %p143_p1 = scmp.eq.s32.totalorder %s142_s26, 0  ;;  %p156_p2 = scmp.eq.s32.totalorder %s1363_s22, 1 }
   0x7   : > { %p161_p3 = scmp.ne.s32.totalorder %s1299_s19, %s1295_s18  ;;  %p162_p4 = scmp.eq.s32.totalorder %s1075_s23, 1 }
   0x8   : > { %s1378_s27 = scalar_select %p143_p1, %s1303_s20, %s145_s25  }
   0x9   : > { %p1380_p5 = por %p156_p2, %p155_p0  ;;  %p1384_p6 = por %p162_p4, %p161_p3 }
   0xa   : > { %p1078_p7 = scmp.ge.s32.totalorder %s1307_s21, 1  ;;  %p213_p8 = scmp.lt.s32.totalorder %s1307_s21, 3 }
   0xc   : > { %p214_p9 = pnand %p1078_p7, %p213_p8 }
   0xd   : > { %s1080_s9 = sshll.u32 (!%p214_p9), %s1363_s22, 1  ;;  %s1400_s10 = sshll.u32 (!%p214_p9), %s1363_s22, 4 }
   0xe   : > { %217 = sbr.rel (%p214_p9) target bundleno = 506 (0x1fa), region = 40  ;;  %p264_p10 = scmp.lt.s32.totalorder (!%p214_p9), %s1400_s10, 31 }
   0xf   : > { %p252_p11 = scmp.lt.s32.totalorder (!%p214_p9), %s1080_s9, 3  ;;  %s985_s11 = scalar_lea.hbm (!%p214_p9), %s1806_s5, %s1400_s10 }
  0x10   : > { %s1265_s22 = scalar_lea.hbm (!%p214_p9), %s1806_s5, 32 }
  0x13   : > { %v1393_v0 = vld [vmem:[%s1804_s3 + $0x38] sm:$0xff]  ;;  %v1407_v2 = vld [vmem:[%s1804_s3 + $0x30] sm:$0xff]  ;;  %s265_s15 = scalar_select %p264_p10, %s1400_s10, 31  ;;  %v1417_v4 = vld [vmem:[%s1804_s3 + $0x28] sm:$0xff]  ;;  %vm511_vm0 = vcmask 1041409   ;;  %vm514_vm1 = vcmask 1042434  }
  0x14   : > { %v1197_v1 = vld [vmem:[%s1805_s4 + $0x38] sm:$0xff]  ;;  %595 = vmatpush.bf16.msra.mxu0 %v1393_v0  ;;  %v1196_v3 = vld [vmem:[%s1805_s4 + $0x30] sm:$0xff]  ;;  %v1195_v5 = vld [vmem:[%s1805_s4 + $0x28] sm:$0xff]  ;;  %s1814_s9 = smov (!%p252_p11, %s1080_s9), 3  ;;  %vm517_vm2 = vcmask 1043459   ;;  %vm520_vm3 = vcmask 1044484  }
  0x15   : > { %668 = vmatpush.bf16.msra.mxu1 %v1197_v1  ;;  %s1085_s25 = sshll.u32 %s265_s15, 2  ;;  %v1434_v7 = vld [vmem:[%s1804_s3 + $0x20] sm:$0xff]  ;;  %s1081_s13 = sshll.u32 %s1814_s9, 2  ;;  %v1465_v16 = vld [vmem:[%s1804_s3 + $0x18] sm:$0xff]  ;;  %v1494_v28 = vld [vmem:[%s1804_s3 + $0x10] sm:$0xff]  ;;  %vm685_vm4 = vcmask 523264  }
  0x16   : > { %s1425_s6 = scalar_lea.vmem %s1803_s2, %s1085_s25  ;;  %v1194_v8 = vld [vmem:[%s1805_s4 + $0x20] sm:$0xff]  ;;  %s1452_s16 = scalar_lea.vmem %s1801_s0, %s1081_s13  ;;  %v1193_v17 = vld [vmem:[%s1805_s4 + $0x18] sm:$0xff]  ;;  %v1192_v29 = vld [vmem:[%s1805_s4 + $0x10] sm:$0xff]  ;;  %v711_v61 = vsel %vm685_vm4, %v1393_v0, 0  ;;  %vm523_vm5 = vcmask 1045509   ;;  %vm526_vm6 = vcmask 1046534  }
  0x17   : > { %v1428_v6 = vld [vmem:[%s1425_s6 + $0x4] sm:$0xf]  ;;  %v1440_v9 = vld [vmem:[%s1425_s6 + $0x8] sm:$0xf]  ;;  %v1455_v13 = vld [vmem:[%s1425_s6] sm:$0xf]  ;;  %s1476_s30 = scalar_lea.vmem %s1802_s1, %s1081_s13  ;;  %713 = vmatpush.bf16.xpose.msra.mxu2 %v711_v61 }
  0x18   : > { %596 = vmatpush.bf16.msra.mxu0 %v1407_v2  ;;  %v1443_v10 = vld [vmem:[%s1425_s6 + $0x24] sm:$0xf]  ;;  %v1446_v11 = vld [vmem:[%s1425_s6 + $0x28] sm:$0xf]  ;;  %v463_v12 = vunpack.c.l.b16 %v1428_v6  ;;  %v1458_v14 = vld [vmem:[%s1425_s6 + $0x20] sm:$0xf]  ;;  %v464_v22 = vunpack.c.l.b16 %v1440_v9  ;;  %v462_v24 = vunpack.c.l.b16 %v1455_v13 }
  0x19   : > { %669 = vmatpush.bf16.msra.mxu1 %v1196_v3  ;;  %v471_v15 = vunpack.c.l.b16 %v1443_v10  ;;  %v1471_v18 = vld [vmem:[%s1452_s16] sm:$0xff]   ;;  %v1482_v20 = vld [vmem:[%s1425_s6 + $0xc] sm:$0xf]  ;;  %v472_v23 = vunpack.c.l.b16 %v1446_v11  ;;  %v470_v25 = vunpack.c.l.b16 %v1458_v14  ;;  %v1503_v32 = vld [vmem:[%s1425_s6 + $0x10] sm:$0xf]  ;;  %vm529_vm7 = vcmask 1047559  }
  0x1a   : > { %v1479_v19 = vld [vmem:[%s1476_s30] sm:$0xff]   ;;  %v1485_v21 = vld [vmem:[%s1425_s6 + $0x2c] sm:$0xf]  ;;  %v1091_v26 = vunpack.i.l.s16 %v463_v12  ;;  %v322_v30 = vunpack.c.l.bf16 %v1471_v18  ;;  %v1506_v33 = vld [vmem:[%s1425_s6 + $0x30] sm:$0xf]  ;;  %v465_v34 = vunpack.c.l.b16 %v1482_v20  ;;  %v1092_v36 = vunpack.i.l.s16 %v464_v22  ;;  %s988_s13 = sshll.u32 %s985_s11, 4  ;;  %s989_s13 = int_to_ptr.hbm [resolvable:$true] %s988_s13 }
  0x1b   : > { %v1099_v27 = vunpack.i.l.s16 %v471_v15  ;;  %v324_v31 = vunpack.c.l.bf16 %v1479_v19  ;;  %v473_v35 = vunpack.c.l.b16 %v1485_v21  ;;  %v1100_v37 = vunpack.i.l.s16 %v472_v23  ;;  %v1511_v38 = vld [vmem:[%s1425_s6 + $0x14] sm:$0xf]  ;;  %v1516_v43 = vld [vmem:[%s1804_s3 + $0x8] sm:$0xff]  ;;  %v1532_v51 = vld [vmem:[%s1425_s6 + $0x18] sm:$0xf]  ;;  %s1259_s15 = sshra.s32 %s989_s13, 4  ;;  %s1260_s15 = int_to_ptr.hbm [resolvable:$true] %s1259_s15 }
  0x1c   : > { %597 = vmatpush.bf16.msra.mxu0 %v1417_v4  ;;  %v1090_v39 = vunpack.i.l.s16 %v462_v24  ;;  %v1098_v40 = vunpack.i.l.s16 %v470_v25  ;;  %v510_v41 = vrot.slane %v1091_v26, 7  ;;  %v323_v44 = vunpack.c.h.bf16 %v1471_v18  ;;  %v1520_v45 = vld [vmem:[%s1425_s6 + $0x34] sm:$0xf]  ;;  %v1191_v48 = vld [vmem:[%s1805_s4 + $0x8] sm:$0xff]  ;;  %v1535_v52 = vld [vmem:[%s1425_s6 + $0x38] sm:$0xf]  ;;  %p1266_p1 = scmp.lt.s32.totalorder %s1260_s15, %s1806_s5 }
  0x1d   : > { %670 = vmatpush.bf16.msra.mxu1 %v1195_v5  ;;  %v531_v42 = vrot.slane %v1099_v27, 7  ;;  %v466_v46 = vunpack.c.l.b16 %v1503_v32  ;;  %v474_v47 = vunpack.c.l.b16 %v1506_v33  ;;  %v325_v49 = vunpack.c.h.bf16 %v1479_v19  ;;  %v1546_v62 = vld [vmem:[%s1804_s3] sm:$0xff]  ;;  %v1560_v23 = vld [vmem:[%s1425_s6 + $0x3c] sm:$0xf]  ;;  %s1261_s10 = scalar_lea.hbm %s1260_s15, 16 }
  0x1e   : > { %v1529_v50 = vmul.f32 %v324_v31, %v322_v30  ;;  %v1093_v53 = vunpack.i.l.s16 %v465_v34  ;;  %v1101_v54 = vunpack.i.l.s16 %v473_v35  ;;  %v467_v55 = vunpack.c.l.b16 %v1511_v38  ;;  %v1190_v0 = vld [vmem:[%s1805_s4] sm:$0xff]  ;;  %p1262_p12 = scmp.ne.s32.totalorder %s1260_s15, %s1261_s10  ;;  %p1267_p2 = scmp.lt.s32.totalorder %s1265_s22, %s1261_s10 }
  0x1f   : > { %v513_v56 = vrot.slane %v1092_v36, 6  ;;  %v533_v57 = vrot.slane %v1100_v37, 6  ;;  %v475_v58 = vunpack.c.l.b16 %v1520_v45  ;;  %v512_v59 = vsel %vm511_vm0, %v510_v41, %v1090_v39  ;;  %v1180_v35 = vld [vmem:[%s1452_s16] sm:$0xff]  ;;  %s248_s16 = sand.u32 1, %s1299_s19  }
  0x20   : > { %598 = vmatpush.bf16.msra.mxu0 %v1434_v7  ;;  %v532_v60 = vsel %vm511_vm0, %v531_v42, %v1098_v40  ;;  %v468_v63 = vunpack.c.l.b16 %v1532_v51  ;;  %v476_v1 = vunpack.c.l.b16 %v1535_v52  ;;  %v1094_v3 = vunpack.i.l.s16 %v466_v46  ;;  %v1181_v36 = vld [vmem:[%s1476_s30] sm:$0xff]  ;;  %s1079_s26 = sshll.u32 %s248_s16, 4  ;;  %s974_s14 = scalar_lea.sflag [#allocation3], %s248_s16 }
  0x21   : > { %671 = vmatpush.bf16.msra.mxu1 %v1194_v8  ;;  %v1102_v5 = vunpack.i.l.s16 %v474_v47  ;;  %v1555_v8 = vld [vmem:[%s1425_s6 + $0x1c] sm:$0xf]  ;;  %v516_v12 = vrot.slane %v1093_v53, 5  ;;  %v535_v15 = vrot.slane %v1101_v54, 5  ;;  %v347_v22 = vrot.slane %v1529_v50, 2  ;;  %s1309_s6 = smov 16   ;;  %p1263_p13 = pnand %p1262_p12, %p1380_p5 }
  0x22   : > { %v515_v24 = vsel %vm514_vm1, %v513_v56, %v512_v59  ;;  %v534_v25 = vsel %vm514_vm1, %v533_v57, %v532_v60  ;;  %v329_v26 = vunpack.c.l.bf16 %v1482_v20  ;;  %v348_v27 = vrot.slane %v1529_v50, 3  ;;  %s250_s30 = scalar_lea.vmem [#allocation2], %s1079_s26  ;;  %p1268_p3 = por %p1267_p2, %p1266_p1 }
  0x23   : > { %v1103_v30 = vunpack.i.l.s16 %v475_v58  ;;  %v362_v31 = vperm.slane %v347_v22, 0  ;;  %v350_v34 = vrot.slane %v1529_v50, 5  ;;  %v469_v37 = vunpack.c.l.b16 %v1555_v8  ;;  %s986_s12 = sshll.u32 %s250_s30, 4  ;;  %p1264_p0 = pneg %p1263_p13  ;;  %s987_s12 = int_to_ptr.vmem [resolvable:$true] %s986_s12 }
  0x24   : > { %599 = vmatpush.bf16.msra.mxu0 %v1465_v16  ;;  %v519_v39 = vrot.slane %v1094_v3, 4  ;;  %v537_v40 = vrot.slane %v1102_v5, 4  ;;  %v363_v41 = vperm.slane %v348_v27, 0  ;;  %v477_v42 = vunpack.c.l.b16 %v1560_v23 }
  0x25   : > { %672 = vmatpush.bf16.msra.mxu1 %v1193_v17  ;;  %v328_v17 = vunpack.c.l.bf16 %v1440_v9  ;;  %v518_v46 = vsel %vm517_vm2, %v516_v12, %v515_v24  ;;  %v536_v47 = vsel %vm517_vm2, %v535_v15, %v534_v25  ;;  %v1096_v53 = vunpack.i.l.s16 %v468_v63  ;;  %p1269_p4 = pnand %p1268_p3, %p1264_p0 }
  0x26   : > { %v1104_v54 = vunpack.i.l.s16 %v476_v1  ;;  %v395_v56 = vmul.f32 %v363_v41, %v329_v26  ;;  %v539_v58 = vrot.slane %v1103_v30, 3  ;;  %v331_v59 = vunpack.c.l.bf16 %v1511_v38 }
  0x27   : > { %v365_v60 = vperm.slane %v350_v34, 0  ;;  %v521_v61 = vsel %vm520_vm3, %v519_v39, %v518_v46  ;;  %v538_v63 = vsel %vm520_vm3, %v537_v40, %v536_v47  ;;  %v1097_v1 = vunpack.i.l.s16 %v469_v37 }
  0x28   : > { %600 = vmatpush.bf16.msra.mxu0 %v1494_v28  ;;  %v1105_v3 = vunpack.i.l.s16 %v477_v42  ;;  %414 = vadd.xlane.f32.xlu2 %v395_v56  ;;  %v351_v5 = vrot.slane %v1529_v50, 6  ;;  %v525_v12 = vrot.slane %v1096_v53, 2  ;;  %v541_v15 = vrot.slane %v1104_v54, 2 }
  0x29   : > { %673 = vmatpush.bf16.msra.mxu1 %v1192_v29  ;;  %v1095_v29 = vunpack.i.l.s16 %v467_v55  ;;  %v708_v55 = vsel %vm685_vm4, %v1407_v2, 0  ;;  %v332_v2 = vunpack.c.l.bf16 %v1532_v51  ;;  %v540_v24 = vsel %vm523_vm5, %v539_v58, %v538_v63 }
  0x2a   : > { %714 = vmatpush.bf16.xpose.msra.mxu2 %v708_v55  ;;  %v397_v25 = vmul.f32 %v365_v60, %v331_v59  ;;  %v366_v27 = vperm.slane %v351_v5, 0  ;;  %v543_v30 = vrot.slane %v1105_v3, 1  ;;  %v702_v40 = vsel %vm685_vm4, %v1434_v7, 0 }
  0x2b   : > { %v522_v57 = vrot.slane %v1095_v29, 3  ;;  %v528_v29 = vrot.slane %v1097_v1, 1  ;;  %v696_v41 = vsel %vm685_vm4, %v1494_v28, 0  ;;  %v693_v42 = vsel %vm685_vm4, %v1516_v43, 0 }
  0x2c   : > { %601 = vmatpush.bf16.msra.mxu0 %v1516_v43  ;;  %v398_v18 = vmul.f32 %v366_v27, %v332_v2  ;;  %v335_v7 = vunpack.c.l.bf16 %v1443_v10  ;;  %v337_v53 = vunpack.c.l.bf16 %v1485_v21  ;;  %v326_v55 = vunpack.c.l.bf16 %v1455_v13 }
  0x2d   : > { %674 = vmatpush.bf16.msra.mxu1 %v1191_v48  ;;  %v394_v48 = vmul.f32 %v362_v31, %v328_v17  ;;  %v524_v22 = vsel %vm523_vm5, %v522_v57, %v521_v61  ;;  %v334_v31 = vunpack.c.l.bf16 %v1458_v14  ;;  %v360_v56 = vperm.slane %v1529_v50, 0 }
  0x2e   : > { %v527_v19 = vsel %vm526_vm6, %v525_v12, %v524_v22  ;;  %v338_v60 = vunpack.c.l.bf16 %v1506_v33  ;;  %v340_v63 = vunpack.c.l.bf16 %v1535_v52  ;;  %v346_v12 = vrot.slane %v1529_v50, 1 }
  0x2f   : > { %412 = vadd.xlane.f32.xlu1 %v394_v48  ;;  %v341_v27 = vunpack.c.l.bf16 %v1560_v23  ;;  %vm965_vm14 = vcmask 130048   ;;  %vm962_vm15 = vcmask 64512  }
  0x30   : > { %602 = vmatpush.bf16.msra.mxu0 %v1546_v62  ;;  %420 = vadd.xlane.f32.xlu2 %v398_v18  ;;  %v361_v22 = vperm.slane %v346_v12, 0  ;;  %v349_v18 = vrot.slane %v1529_v50, 4 }
  0x31   : > { %675 = vmatpush.bf16.msra.mxu1 %v1190_v0  ;;  %v1589_v0 = vmul.f32 %v325_v49, %v323_v44  ;;  %v542_v44 = vsel %vm526_vm6, %v541_v15, %v540_v24  ;;  %v705_v49 = vsel %vm685_vm4, %v1417_v4, 0  ;;  %v699_v4 = vsel %vm685_vm4, %v1465_v16, 0 }
  0x32   : > { %715 = vmatpush.bf16.xpose.msra.mxu2 %v705_v49  ;;  %v690_v16 = vsel %vm685_vm4, %v1546_v62, 0  ;;  %v392_v62 = vmul.f32 %v360_v56, %v326_v55  ;;  %v327_v15 = vunpack.c.l.bf16 %v1428_v6 }
  0x33   : > { %603 = vmatmul.bf16.vlgmr.msra.gmra.mxu0 %v1180_v35  ;;  %v368_v34 = vperm.slane %v1589_v0, 0  ;;  %v530_v35 = vsel %vm529_vm7, %v528_v29, %v527_v19  ;;  %v353_v46 = vrot.slane %v1589_v0, 1  ;;  %v355_v47 = vrot.slane %v1589_v0, 3 }
  0x34   : > { %676 = vmatmul.bf16.vlgmr.msra.gmra.mxu1 %v1181_v36  ;;  %v544_v36 = vsel %vm529_vm7, %v543_v30, %v542_v44  ;;  %v356_v57 = vrot.slane %v1589_v0, 4  ;;  %v358_v58 = vrot.slane %v1589_v0, 6  ;;  %408 = vadd.xlane.f32.xlu0 %v392_v62  ;;  %v359_v24 = vrot.slane %v1589_v0, 7 }
  0x35   : > { %v400_v37 = vmul.f32 %v368_v34, %v334_v31  ;;  %v545_v39 = vpack.c.b16 %v544_v36, %v530_v35  ;;  %v369_v48 = vperm.slane %v353_v46, 0  ;;  %v371_v54 = vperm.slane %v355_v47, 0 }
  0x36   : > { %v372_v61 = vperm.slane %v356_v57, 0  ;;  %v374_v1 = vperm.slane %v358_v58, 0  ;;  %v375_v29 = vperm.slane %v359_v24, 0  ;;  %v330_v19 = vunpack.c.l.bf16 %v1503_v32 }
  0x37   : > { %418 = vadd.xlane.f32.xlu1 %v397_v25  ;;  %v401_v28 = vmul.f32 %v369_v48, %v335_v7  ;;  %v403_v43 = vmul.f32 %v371_v54, %v337_v53  ;;  %v393_v25 = vmul.f32 %v361_v22, %v327_v15  ;;  %v364_v44 = vperm.slane %v349_v18, 0 }
  0x38   : > { %v404_v3 = vmul.f32 %v372_v61, %v338_v60  ;;  %v406_v5 = vmul.f32 %v374_v1, %v340_v63  ;;  %v407_v30 = vmul.f32 %v375_v29, %v341_v27  ;;  %v333_v34 = vunpack.c.l.bf16 %v1555_v8 }
  0x39   : > { %426 = vadd.xlane.f32.xlu2 %v401_v28  ;;  %v396_v49 = vmul.f32 %v364_v44, %v330_v19  ;;  %v352_v35 = vrot.slane %v1529_v50, 7  ;;  %v357_v47 = vrot.slane %v1589_v0, 5  ;;  %v339_v28 = vunpack.c.l.bf16 %v1520_v45 }
  0x3a   : > { %716 = vmatpush.bf16.xpose.msra.mxu2 %v702_v40 }
  0x3b   : > { %v367_v36 = vperm.slane %v352_v35, 0 }
  0x3c   : > { %410 = vadd.xlane.f32.xlu0 %v393_v25 }
  0x3f   : > { %424 = vadd.xlane.f32.xlu1 %v400_v37  ;;  %v354_v37 = vrot.slane %v1589_v0, 2 }
  0x41   : > { %432 = vadd.xlane.f32.xlu2 %v404_v3 }
  0x42   : > { %717 = vmatpush.bf16.xpose.msra.mxu2 %v699_v4  ;;  %v399_v4 = vmul.f32 %v367_v36, %v333_v34 }
  0x43   : > { %608 = vmatmul.bf16.gmra.mxu0 %v545_v39 }
  0x44   : > { %416 = vadd.xlane.f32.xlu0 %v396_v49 }
  0x47   : > { %430 = vadd.xlane.f32.xlu1 %v403_v43  ;;  %v373_v43 = vperm.slane %v357_v47, 0 }
  0x49   : > { %438 = vadd.xlane.f32.xlu2 %v407_v30  ;;  %v405_v57 = vmul.f32 %v373_v43, %v339_v28 }
  0x4a   : > { %718 = vmatpush.bf16.xpose.msra.mxu2 %v696_v41  ;;  %v336_v41 = vunpack.c.l.bf16 %v1446_v11 }
  0x4c   : > { %422 = vadd.xlane.f32.xlu0 %v399_v4 }
  0x4f   : > { %436 = vadd.xlane.f32.xlu1 %v406_v5  ;;  %v871_v5 = vlaneseq }
  0x51   : > { %v1672_v24 = vand.u32 127, %v871_v5 }
  0x52   : > { %719 = vmatpush.bf16.xpose.msra.mxu2 %v693_v42  ;;  %v370_v42 = vperm.slane %v354_v37, 0 }
  0x54   : > { %v402_v46 = vmul.f32 %v370_v42, %v336_v41 }
  0x56   : > { %428 = vadd.xlane.f32.xlu0 %v402_v46 }
  0x5a   : > { %720 = vmatpush.bf16.xpose.msra.mxu2 %v690_v16 }
  0x5e   : > { %434 = vadd.xlane.f32.xlu0 %v405_v57 }
  0x9b   : > { %v415_v25 = vpop.xlane.xlu2 %414 }
  0xa2   : > { %v413_v12 = vpop.xlane.xlu1 %412 }
  0xa3   : > { %v875_v30 = vperm.slane %v413_v12, %v1672_v24  ;;  %v421_v37 = vpop.xlane.xlu2 %420 }
  0xa4   : > { %v879_v46 = vperm.slane %v421_v37, %v1672_v24 }
  0xa7   : > { %v409_v22 = vpop.xlane.xlu0 %408 }
  0xa8   : > { %v873_v29 = vperm.slane %v409_v22, %v1672_v24 }
  0xaa   : > { %v419_v49 = vpop.xlane.xlu1 %418 }
  0xab   : > { %v878_v42 = vperm.slane %v419_v49, %v1672_v24 }
  0xaf   : > { %v411_v18 = vpop.xlane.xlu0 %410 }
  0xb0   : > { %v604_v39 = vpop.f32.mrf.mxu0  ;;  %v874_v44 = vperm.slane %v411_v18, %v1672_v24 }
  0xb1   : > { %v677_v40 = vpop.f32.mrf.mxu1 }
  0xb2   : > { %v682_v50 = vmul.f32 %v677_v40, %v604_v39  ;;  %v889_v35 = vsel %vm511_vm0, %v874_v44, %v873_v29  ;;  %v876_v40 = vperm.slane %v415_v25, %v1672_v24  ;;  %v425_v4 = vpop.xlane.xlu1 %424 }
  0xb3   : > { %v890_v36 = vsel %vm514_vm1, %v875_v30, %v889_v35 }
  0xb7   : > { %v417_v39 = vpop.xlane.xlu0 %416 }
  0xb8   : > { %v606_v48 = vpop.f32.mrf.mxu0  ;;  %v877_v47 = vperm.slane %v417_v39, %v1672_v24 }
  0xb9   : > { %v679_v54 = vpop.f32.mrf.mxu1 }
  0xba   : > { %v683_v16 = vmul.f32 %v679_v54, %v606_v48  ;;  %v891_v48 = vsel %vm517_vm2, %v876_v40, %v890_v36 }
  0xbc   : > { %v684_v56 = vpack.c.bf16 %v683_v16, %v682_v50  ;;  %v427_v50 = vpop.xlane.xlu2 %426  ;;  %v892_v16 = vsel %vm520_vm3, %v877_v47, %v891_v48 }
  0xbd   : > { %v893_v43 = vsel %vm523_vm5, %v878_v42, %v892_v16 }
  0xbe   : > { %1174 = vmatmul.msk.bf16.vlgmr.msra.gmra.mxu2 %vm685_vm4, %v684_v56  ;;  %v894_v57 = vsel %vm526_vm6, %v879_v46, %v893_v43 }
  0xbf   : > { %v423_v54 = vpop.xlane.xlu0 %422 }
  0xc0   : > { %v1662_v58 = vpop.f32.mrf.mxu0  ;;  %v880_v56 = vperm.slane %v423_v54, %v1672_v24 }
  0xc1   : > { %v823_v62 = vmul.f32 %v1662_v58, %v1662_v58 }
  0xc3   : > { %v825_v0 = vsel %vm685_vm4, %v823_v62, 0.0  ;;  %v1689_v62 = vsel %vm529_vm7, %v880_v56, %v894_v57 }
  0xc4   : > { %826 = vadd.xlane.f32.xlu1 %v825_v0  ;;  %v881_v0 = vperm.slane %v425_v4, %v1672_v24  ;;  %v433_v29 = vpop.xlane.xlu2 %432 }
  0xc5   : > { %v885_v30 = vperm.slane %v433_v29, %v1672_v24 }
  0xc8   : > { %v1667_v61 = vpop.f32.mrf.mxu0 }
  0xc9   : > { %v824_v1 = vmul.f32 %v1667_v61, %v1667_v61  ;;  %v429_v22 = vpop.xlane.xlu0 %428 }
  0xca   : > { %v883_v25 = vperm.slane %v429_v22, %v1672_v24 }
  0xcb   : > { %v828_v3 = vsel %vm685_vm4, %v824_v1, 0.0  ;;  %v882_v1 = vperm.slane %v427_v50, %v1672_v24  ;;  %vm968_vm4 = vcmask 654336  }
  0xcc   : > { %829 = vadd.xlane.f32.xlu2 %v828_v3  ;;  %v431_v3 = vpop.xlane.xlu1 %430  ;;  %v439_v48 = vpop.xlane.xlu2 %438 }
  0xcd   : > { %v896_v5 = vsel %vm511_vm0, %v882_v1, %v881_v0  ;;  %v884_v12 = vperm.slane %v431_v3, %v1672_v24  ;;  %v888_v50 = vperm.slane %v439_v48, %v1672_v24 }
  0xce   : > { %v897_v18 = vsel %vm514_vm1, %v883_v25, %v896_v5 }
  0xcf   : > { %v898_v44 = vsel %vm517_vm2, %v884_v12, %v897_v18 }
  0xd0   : > { %v899_v35 = vsel %vm520_vm3, %v885_v30, %v898_v44 }
  0xd1   : > { %v435_v37 = vpop.xlane.xlu0 %434 }
  0xd2   : > { %v886_v39 = vperm.slane %v435_v37, %v1672_v24 }
  0xd4   : > { %v437_v49 = vpop.xlane.xlu1 %436  ;;  %v900_v40 = vsel %vm523_vm5, %v886_v39, %v899_v35 }
  0xd5   : > { %v887_v36 = vperm.slane %v437_v49, %v1672_v24 }
  0xd7   : > { %v901_v4 = vsel %vm526_vm6, %v887_v36, %v900_v40 }
  0xd8   : > { %v1712_v22 = vsel %vm529_vm7, %v888_v50, %v901_v4 }
 0x137   : > { %v827_v36 = vpop.xlane.xlu1 %826 }
 0x138   : > { %v831_v51 = vadd.f32 1e-12, %v827_v36 }
 0x13a   : > { %vm839_vm10 = vweird.f32 %v831_v51 }
 0x141   : > { %v722_v42 = vpop.f32.mrf.mxu2 }
 0x142   : > { %v743_v46 = vperm.slane %v722_v42, 0  ;;  %v732_v47 = vrot.slane %v722_v42, 4  ;;  %v729_v54 = vrot.slane %v722_v42, 1  ;;  %v731_v56 = vrot.slane %v722_v42, 3 }
 0x143   : > { %v735_v1 = vrot.slane %v722_v42, 7  ;;  %v730_v5 = vrot.slane %v722_v42, 2  ;;  %v734_v29 = vrot.slane %v722_v42, 6 }
 0x144   : > { %v775_v16 = vmul.f32 %v743_v46, %v326_v55  ;;  %v747_v43 = vperm.slane %v732_v47, 0  ;;  %v744_v57 = vperm.slane %v729_v54, 0  ;;  %v746_v12 = vperm.slane %v731_v56, 0 }
 0x145   : > { %v750_v13 = vperm.slane %v735_v1, 0  ;;  %v745_v55 = vperm.slane %v730_v5, 0  ;;  %v749_v30 = vperm.slane %v734_v29, 0 }
 0x146   : > { %791 = vadd.xlane.f32.xlu0 %v775_v16  ;;  %v779_v0 = vmul.f32 %v747_v43, %v330_v19  ;;  %v776_v3 = vmul.f32 %v744_v57, %v327_v15  ;;  %v778_v25 = vmul.f32 %v746_v12, %v329_v26  ;;  %v733_v15 = vrot.slane %v722_v42, 5 }
 0x147   : > { %v782_v32 = vmul.f32 %v750_v13, %v333_v34  ;;  %v777_v6 = vmul.f32 %v745_v55, %v328_v17  ;;  %v781_v49 = vmul.f32 %v749_v30, %v332_v2  ;;  %v830_v34 = vpop.xlane.xlu2 %829 }
 0x148   : > { %799 = vadd.xlane.f32.xlu2 %v779_v0  ;;  %793 = vadd.xlane.f32.xlu1 %v776_v3  ;;  %v748_v44 = vperm.slane %v733_v15, 0  ;;  %v832_v37 = vadd.f32 1e-12, %v830_v34 }
 0x149   : > { %v724_v19 = vpop.f32.mrf.mxu2 }
 0x14a   : > { %v751_v18 = vperm.slane %v724_v19, 0  ;;  %v736_v20 = vrot.slane %v724_v19, 1  ;;  %v737_v8 = vrot.slane %v724_v19, 2  ;;  %v780_v9 = vmul.f32 %v748_v44, %v331_v59 }
 0x14b   : > { %v738_v17 = vrot.slane %v724_v19, 3  ;;  %v739_v4 = vrot.slane %v724_v19, 4  ;;  %1241 = vrsqrt.f32 %v832_v37  ;;  %v740_v38 = vrot.slane %v724_v19, 5 }
 0x14c   : > { %v783_v26 = vmul.f32 %v751_v18, %v334_v31  ;;  %v752_v35 = vperm.slane %v736_v20, 0  ;;  %v753_v39 = vperm.slane %v737_v8, 0  ;;  %v741_v31 = vrot.slane %v724_v19, 6 }
 0x14d   : > { %v754_v40 = vperm.slane %v738_v17, 0  ;;  %1243 = vrsqrt.f32 %v831_v51  ;;  %v755_v42 = vperm.slane %v739_v4, 0  ;;  %v756_v46 = vperm.slane %v740_v38, 0 }
 0x14e   : > { %797 = vadd.xlane.f32.xlu0 %v778_v25  ;;  %v784_v2 = vmul.f32 %v752_v35, %v335_v7  ;;  %v785_v14 = vmul.f32 %v753_v39, %v336_v41  ;;  %v757_v47 = vperm.slane %v741_v31, 0  ;;  %v742_v7 = vrot.slane %v724_v19, 7 }
 0x14f   : > { %v786_v59 = vmul.f32 %v754_v40, %v337_v53  ;;  %v787_v10 = vmul.f32 %v755_v42, %v338_v60  ;;  %v788_v11 = vmul.f32 %v756_v46, %v339_v28  ;;  %vm849_vm8 = vweird.f32 %v832_v37 }
 0x150   : > { %805 = vadd.xlane.f32.xlu2 %v782_v32  ;;  %795 = vadd.xlane.f32.xlu1 %v777_v6  ;;  %v789_v21 = vmul.f32 %v757_v47, %v340_v63  ;;  %v758_v53 = vperm.slane %v742_v7, 0  ;;  %v921_v19 = vadd.s32 4294967288, %v1672_v24 }
 0x151   : > { %v1242_v48 = vpop.eup %1241 }
 0x152   : > { %v844_v41 = vmul.f32 %v1242_v48, %v832_v37  ;;  %v790_v43 = vmul.f32 %v758_v53, %v341_v27  ;;  %vm850_vm9 = vweird.f32 %v1242_v48 }
 0x153   : > { %v1244_v54 = vpop.eup %1243  ;;  %vm851_vm12 = vmor %vm849_vm8, %vm850_vm9 }
 0x154   : > { %v834_v50 = vmul.f32 %v1244_v54, %v831_v51  ;;  %v845_v16 = vmul.f32 %v1242_v48, %v844_v41  ;;  %vm840_vm11 = vweird.f32 %v1244_v54 }
 0x155   : > { %vm841_vm13 = vmor %vm839_vm10, %vm840_vm11 }
 0x156   : > { %803 = vadd.xlane.f32.xlu0 %v781_v49  ;;  %v835_v33 = vmul.f32 %v1244_v54, %v834_v50  ;;  %v846_v60 = vmul.f32 0.5, %v845_v16 }
 0x158   : > { %807 = vadd.xlane.f32.xlu2 %v783_v26  ;;  %801 = vadd.xlane.f32.xlu1 %v780_v9  ;;  %v836_v56 = vmul.f32 0.5, %v835_v33  ;;  %v847_v57 = vsub.f32 1.5, %v846_v60 }
 0x15a   : > { %v837_v0 = vsub.f32 1.5, %v836_v56  ;;  %v848_v45 = vmul.f32 %v1242_v48, %v847_v57 }
 0x15c   : > { %v838_v52 = vmul.f32 %v1244_v54, %v837_v0  ;;  %v852_v63 = vsel %vm851_vm12, %v1242_v48, %v848_v45 }
 0x15d   : > { %v854_v1 = vmul.f32 %v852_v63, %v1667_v61 }
 0x15e   : > { %809 = vadd.xlane.f32.xlu0 %v784_v2  ;;  %v842_v28 = vsel %vm841_vm13, %v1244_v54, %v838_v52 }
 0x15f   : > { %v853_v23 = vmul.f32 %v842_v28, %v1662_v58 }
 0x160   : > { %811 = vadd.xlane.f32.xlu2 %v785_v14  ;;  %813 = vadd.xlane.f32.xlu1 %v786_v59 }
 0x166   : > { %815 = vadd.xlane.f32.xlu0 %v787_v10 }
 0x168   : > { %817 = vadd.xlane.f32.xlu2 %v788_v11  ;;  %819 = vadd.xlane.f32.xlu1 %v789_v21 }
 0x16e   : > { %821 = vadd.xlane.f32.xlu0 %v790_v43 }
 0x180   : > { %958 = vrot.lane.b32.xlu2 %v854_v1, %s1309_s6 }
 0x181   : > { %956 = vrot.lane.b32.xlu1 %v853_v23, %s1309_s6 }
 0x1b9   : > { %v792_v27 = vpop.xlane.xlu0 %791 }
 0x1ba   : > { %v922_v51 = vperm.slane %v792_v27, %v921_v19 }
 0x1bb   : > { %v800_v3 = vpop.xlane.xlu2 %799  ;;  %v794_v5 = vpop.xlane.xlu1 %793 }
 0x1bc   : > { %v923_v36 = vperm.slane %v794_v5, %v921_v19  ;;  %v926_v11 = vperm.slane %v800_v3, %v921_v19 }
 0x1be   : > { %v938_v14 = vsel %vm511_vm0, %v923_v36, %v922_v51 }
 0x1c1   : > { %v798_v12 = vpop.xlane.xlu0 %797 }
 0x1c2   : > { %v925_v42 = vperm.slane %v798_v12, %v921_v19 }
 0x1c3   : > { %v806_v13 = vpop.xlane.xlu2 %805  ;;  %v796_v55 = vpop.xlane.xlu1 %795 }
 0x1c4   : > { %v924_v39 = vperm.slane %v796_v55, %v921_v19  ;;  %v929_v16 = vperm.slane %v806_v13, %v921_v19 }
 0x1c6   : > { %v939_v59 = vsel %vm514_vm1, %v924_v39, %v938_v14 }
 0x1c7   : > { %v940_v10 = vsel %vm517_vm2, %v925_v42, %v939_v59 }
 0x1c8   : > { %v941_v41 = vsel %vm520_vm3, %v926_v11, %v940_v10 }
 0x1c9   : > { %v804_v25 = vpop.xlane.xlu0 %803 }
 0x1ca   : > { %v928_v53 = vperm.slane %v804_v25, %v921_v19 }
 0x1cb   : > { %v808_v29 = vpop.xlane.xlu2 %807  ;;  %v802_v32 = vpop.xlane.xlu1 %801 }
 0x1cc   : > { %v930_v61 = vperm.slane %v808_v29, %v921_v19  ;;  %v927_v7 = vperm.slane %v802_v32, %v921_v19 }
 0x1ce   : > { %v942_v21 = vsel %vm523_vm5, %v927_v7, %v941_v41 }
 0x1cf   : > { %v943_v50 = vsel %vm526_vm6, %v928_v53, %v942_v21 }
 0x1d1   : > { %v810_v6 = vpop.xlane.xlu0 %809 }
 0x1d2   : > { %v931_v15 = vperm.slane %v810_v6, %v921_v19 }
 0x1d3   : > { %v812_v30 = vpop.xlane.xlu2 %811  ;;  %v814_v18 = vpop.xlane.xlu1 %813 }
 0x1d4   : > { %v932_v44 = vperm.slane %v812_v30, %v921_v19  ;;  %v945_v58 = vsel %vm511_vm0, %v931_v15, %v930_v61  ;;  %v933_v49 = vperm.slane %v814_v18, %v921_v19 }
 0x1d6   : > { %v946_v20 = vsel %vm514_vm1, %v932_v44, %v945_v58 }
 0x1d7   : > { %v947_v9 = vsel %vm517_vm2, %v933_v49, %v946_v20 }
 0x1d9   : > { %v816_v26 = vpop.xlane.xlu0 %815 }
 0x1da   : > { %v934_v8 = vperm.slane %v816_v26, %v921_v19 }
 0x1db   : > { %v818_v34 = vpop.xlane.xlu2 %817  ;;  %v820_v24 = vpop.xlane.xlu1 %819 }
 0x1dc   : > { %v935_v17 = vperm.slane %v818_v34, %v921_v19  ;;  %v948_v35 = vsel %vm520_vm3, %v934_v8, %v947_v9  ;;  %v936_v37 = vperm.slane %v820_v24, %v921_v19 }
 0x1de   : > { %v949_v40 = vsel %vm523_vm5, %v935_v17, %v948_v35 }
 0x1df   : > { %v950_v38 = vsel %vm526_vm6, %v936_v37, %v949_v40 }
 0x1e1   : > { %v822_v2 = vpop.xlane.xlu0 %821 }
 0x1e2   : > { %v937_v4 = vperm.slane %v822_v2, %v921_v19 }
 0x1e3   : > { %v959_v46 = vpop.permute.xlu2 %958 }
 0x1e4   : > { %v951_v31 = vsel %vm529_vm7, %v937_v4, %v950_v38 }
 0x1e5   : > { %v964_v47 = vsel %vm962_vm15, %v1712_v22, %v951_v31  ;;  %v944_v22 = vsel %vm529_vm7, %v929_v16, %v943_v50 }
 0x1e6   : > { %v967_v48 = vsel %vm965_vm14, %v964_v47, %v959_v46  ;;  %v963_v33 = vsel %vm962_vm15, %v1689_v62, %v944_v22 }
 0x1e7   : > { %v970_v54 = vsel %vm968_vm4, %v967_v48, 0.0 }
 0x1e8   : > { %972 = vst [vmem:[%s250_s30 + $0x8] sm:$0xff] %v970_v54 }
 0x1f3   : > { %v957_v43 = vpop.permute.xlu1 %956 }
 0x1f4   : > { %v966_v60 = vsel %vm965_vm14, %v963_v33, %v957_v43 }
 0x1f5   : > { %v969_v56 = vsel %vm968_vm4, %v966_v60, 0.0 }
 0x1f6   : > { %971 = vst [vmem:[%s250_s30] sm:$0xff] %v969_v56 }
 0x1f7   : > { %1272 = shalt.err (!%p1269_p4)
}
 0x1f8   : > { %s1310_s6 = smov 128   ;;  %s1311_s16 = smov 8  }
 0x1f9   : > { %1199 = dma.vmem_to_hbm [thread:$0]  (%p1380_p5), %s987_s12, 256, %s989_s13, %s974_s14, %s1310_s6, %s1310_s6, %s1311_s16  }
 0x1fa PF: > { %p1205_p7 = scmp.ge.s32.totalorder %s1307_s21, 2  ;;  %s1003_s26 = sand.u32 1, %s1295_s18  }
 0x1fb   : > { %s1004_s30 = scalar_lea.sflag [#allocation3], %s1003_s26 }
 0x1fc   : > { %p1202_p8 = pnand %p1205_p7, %p1384_p6 }
 0x1fe   : > { %p1203_p9 = pneg %p1202_p8 }
 0x200   : > { %1290 = dma.done.wait (%p1203_p9), %s1004_s30, 256  }
 0x201   : > { %1292 = vsyncadd (%p1203_p9), %s1004_s30, 4294967040  ;;  %p15_p10 = scmp.ge.s32.totalorder %s1367_s24, 4   ;;  %s1809_s18 = smov %s1299_s19 }
 0x202   : > { %s1810_s19 = smov %s1303_s20  ;;  %s1811_s20 = smov %s1378_s27 }
 0x203   : > { %s1812_s21 = smov %s1367_s24  ;;  %17 = sbr.rel (!%p15_p10) target bundleno = 3 (0x3), region = 81 }
 0x208   :  { %1010 = vsyncpa [#allocation3], 1 }
 0x209   :  { %1012 = vsyncpa [#allocation3 + $0x1], 1 }

</bundles_post_ra>
